<compile_context>
chip_gen: v7x
topology: tpu7x:2x2x1
jax: 0.10.0
libtpu: 0.0.40
codegen_flags: <defaults>
</compile_context>

<pallas_src>
import functools

import jax
import jax.numpy as jnp
from jax.experimental import pallas as pl
from jax.experimental.pallas import tpu as pltpu


# ReLU after every layer except the bottleneck (idx 3) and the output (idx 7).
_RELU_FLAGS = (True, True, True, False, True, True, True, False)
_NUM_LAYERS = 8


def _round_up(x, m):
    return ((x + m - 1) // m) * m


def _make_kernel(padded_dims, relu_flags):
    """Build the fused 8-layer MLP kernel for a fixed set of padded layer dims.

    padded_dims: tuple of (in_pad, out_pad) per layer, Python ints (multiples
                 of 128) -> all slices below are static / free.
    """

    def kernel(x_ref, w_ref, b_ref, out_ref):
        # x_ref:   (tile, in_pad0)   f32 activations
        # w_ref:   (8, F, F)         bf16 stacked, pre-transposed, zero-padded
        # b_ref:   (8, F)            f32 stacked, zero-padded
        # out_ref: (tile, out_pad7)  f32 reconstruction
        h = x_ref[...]
        for layer in range(_NUM_LAYERS):
            kin, kout = padded_dims[layer]
            w = w_ref[layer, :kin, :kout]           # static slice, bf16 (kin, kout)
            b = b_ref[layer:layer + 1, :kout]       # static slice, f32  (1, kout)
            acc = jnp.dot(h.astype(jnp.bfloat16), w,
                          preferred_element_type=jnp.float32)
            h = acc + b                             # f32 bias-add
            if relu_flags[layer]:
                h = jnp.maximum(h, 0.0)
        out_ref[...] = h.astype(out_ref.dtype)

    return kernel


def prepare_params(params):
    """One-time parameter preparation (hoisted out of the forward path).

    params: list of 8 (W_t, b) with W_t shaped (in_features, out_features)
            (i.e. torch weight already transposed) and b shaped (out_features,)
            or (1, out_features).
    Returns (w_stack bf16 (8,F,F), b_stack f32 (8,F), padded_dims).
    """
    assert len(params) == _NUM_LAYERS
    layer_dims = []
    for (w, _) in params:
        layer_dims.append((int(w.shape[0]), int(w.shape[1])))
    feat_pad = max(_round_up(d, 128) for dims in layer_dims for d in dims)

    w_stack = jnp.zeros((_NUM_LAYERS, feat_pad, feat_pad), jnp.float32)
    b_stack = jnp.zeros((_NUM_LAYERS, feat_pad), jnp.float32)
    for i, (w, b) in enumerate(params):
        w = jnp.asarray(w, jnp.float32)
        b = jnp.asarray(b, jnp.float32).reshape(-1)
        fin, fout = w.shape
        w_stack = w_stack.at[i, :fin, :fout].set(w)
        b_stack = b_stack.at[i, :fout].set(b)

    # bf16 weights: MXU-native operands, half the resident VMEM / DMA bytes.
    w_stack = jax.block_until_ready(w_stack.astype(jnp.bfloat16))
    b_stack = jax.block_until_ready(b_stack)

    padded_dims = tuple(
        (_round_up(fi, 128), _round_up(fo, 128)) for (fi, fo) in layer_dims)
    return w_stack, b_stack, padded_dims


@functools.partial(jax.jit, static_argnames=("padded_dims", "batch_tile"))
def autoencoder_forward(x, w_stack, b_stack, *, padded_dims, batch_tile=512):
    """Fused autoencoder forward: x (B, input_size) f32 -> (B, input_size) f32."""
    B, input_size = x.shape
    x = x.astype(jnp.float32)

    feat_pad = int(w_stack.shape[-1])
    in_pad0 = padded_dims[0][0]
    out_padL = padded_dims[-1][1]

    # ---- batch tiling (multiples of 128) ----------------------------------
    tile = min(int(batch_tile), _round_up(B, 128))
    tile = _round_up(tile, 128)
    B_pad = _round_up(B, tile)
    # Guarantee >= 2 grid steps when the batch allows it, so the "parallel"
    # axis actually shards across v7x's two TensorCores and pipelining exists.
    if B_pad == tile and tile > 128:
        tile = _round_up(tile // 2, 128)
        B_pad = _round_up(B, tile)
    grid = (B_pad // tile,)

    # ---- pad input (single jnp.pad, no zeros+scatter round trip) ----------
    x_pad = jnp.pad(x, ((0, B_pad - B), (0, in_pad0 - input_size)))

    # ---- VMEM budget: generation-aware cap --------------------------------
    x_bytes = 4 * tile * in_pad0
    o_bytes = 4 * tile * out_padL
    param_bytes = 2 * w_stack.size + 4 * b_stack.size      # bf16 W, f32 b (single-buffered)
    act_bytes = 4 * tile * feat_pad
    need = (2 * x_bytes + 2 * o_bytes        # double-buffered x / out tiles
            + param_bytes                    # grid-invariant params (Buffered(1))
            + 8 * act_bytes                  # activation chain + bf16 casts + slack
            + (20 << 20))                    # compiler-internal headroom
    try:
        cap = int(0.75 * pltpu.get_tpu_info().vmem_capacity_bytes)
    except Exception:  # pragma: no cover - conservative fallback (safe on all gens)
        cap = 48 * 1024 * 1024
    vmem_limit = int(min(cap, need))

    kernel = _make_kernel(padded_dims, _RELU_FLAGS)

    x_spec = pl.BlockSpec((tile, in_pad0), lambda i: (i, 0))
    # Grid-invariant parameters: single-buffer them (no re-fetch ever needed).
    w_spec = pl.BlockSpec((_NUM_LAYERS, feat_pad, feat_pad), lambda i: (0, 0, 0),
                          pipeline_mode=pl.Buffered(1))
    b_spec = pl.BlockSpec((_NUM_LAYERS, feat_pad), lambda i: (0, 0),
                          pipeline_mode=pl.Buffered(1))
    out_spec = pl.BlockSpec((tile, out_padL), lambda i: (i, 0))

    out_padded = pl.pallas_call(
        kernel,
        out_shape=jax.ShapeDtypeStruct((B_pad, out_padL), jnp.float32),
        grid_spec=pltpu.PrefetchScalarGridSpec(
            num_scalar_prefetch=0,
            grid=grid,
            in_specs=[x_spec, w_spec, b_spec],
            out_specs=out_spec,
        ),
        compiler_params=pltpu.CompilerParams(
            dimension_semantics=("parallel",),
            vmem_limit_bytes=vmem_limit,
        ),
    )(x_pad, w_stack, b_stack)

    # Strip batch and lane padding.
    return out_padded[:B, :input_size]


def init_params(key, input_size, encoder_size, bottleneck_size):
    """Deterministic synthetic parameters, mirroring nn.Linear shapes.

    Returns both torch-layout params (W(out,in), b(out,)) for the pure-JAX
    reference and kernel-layout params (W_t(in,out), b(out,)).
    """
    layer_dims = [
        (input_size, encoder_size),       # enc L1
        (encoder_size, encoder_size),     # enc L2
        (encoder_size, encoder_size),     # enc L3
        (encoder_size, bottleneck_size),  # enc L4 (bottleneck)
        (bottleneck_size, encoder_size),  # dec L1
        (encoder_size, encoder_size),     # dec L2
        (encoder_size, encoder_size),     # dec L3
        (encoder_size, input_size),       # dec L4 (output)
    ]
    params_torch_layout = []
    params_kernel = []
    for (fan_in, fan_out) in layer_dims:
        key, kw, kb = jax.random.split(key, 3)
        bound = 1.0 / (fan_in ** 0.5)  # torch.nn.Linear default init range
        W = jax.random.uniform(kw, (fan_out, fan_in), jnp.float32,
                               minval=-bound, maxval=bound)
        b = jax.random.uniform(kb, (fan_out,), jnp.float32,
                               minval=-bound, maxval=bound)
        params_torch_layout.append((W, b))
        params_kernel.append((W.T, b))
    return params_torch_layout, params_kernel


def reference_forward(x, params_torch_layout, emulate_bf16=False):
    """Pure-JAX reference matching torch semantics (y = x @ W.T + b)."""
    h = x.astype(jnp.float32)
    for idx, (W, b) in enumerate(params_torch_layout):
        if emulate_bf16:
            h = jnp.dot(h.astype(jnp.bfloat16), W.T.astype(jnp.bfloat16),
                        preferred_element_type=jnp.float32) + b
        else:
            h = h @ W.T + b
        if _RELU_FLAGS[idx]:
            h = jnp.maximum(h, 0.0)
    return h


if __name__ == "__main__":
    # Small shapes consistent with the module's forward (flat feature vectors).
    batch = 8
    input_size = 16
    encoder_size = 32
    bottleneck_size = 8

    key = jax.random.PRNGKey(0)
    key, kx = jax.random.split(key)
    x = jax.random.normal(kx, (batch, input_size), dtype=jnp.float32)

    params_torch_layout, params_kernel = init_params(
        key, input_size, encoder_size, bottleneck_size)

    # One-time parameter padding / stacking (hoisted out of the forward path).
    w_stack, b_stack, padded_dims = prepare_params(params_kernel)

    out = autoencoder_forward(x, w_stack, b_stack,
                              padded_dims=padded_dims, batch_tile=512)
    out = jax.block_until_ready(out)

    ref_bf16 = reference_forward(x, params_torch_layout, emulate_bf16=True)
    ref_f32 = reference_forward(x, params_torch_layout, emulate_bf16=False)

    assert out.shape == (batch, input_size), out.shape
    err_bf16 = float(jnp.max(jnp.abs(out - ref_bf16)))
    err_f32 = float(jnp.max(jnp.abs(out - ref_f32)))
    assert err_bf16 < 2e-3, f"max abs err vs bf16 reference {err_bf16}"
    assert err_f32 < 1e-1, f"max abs err vs f32 reference {err_f32}"

    print("KERNEL_OK")
</pallas_src>

<mosaic_0001>
module attributes {stable_mosaic.version = 11 : i64} {
  func.func @kernel(%arg0: i32, %arg1: memref<128x128xf32, #tpu.memory_space<vmem>>, %arg2: memref<8x128x128xbf16, #tpu.memory_space<vmem>>, %arg3: memref<8x128xf32, #tpu.memory_space<vmem>>, %arg4: memref<128x128xf32, #tpu.memory_space<vmem>>) attributes {dimension_semantics = [#tpu.dimension_semantics<parallel>], iteration_bounds = array<i64: 1>, scalar_prefetch = 0 : i64, scratch_operands = 0 : i64, tpu.core_type = #tpu.core_type<tc>, window_params = [{transform_indices = @transform_0, window_bounds = array<i64: 128, 128>}, {pipeline_mode = #tpu.pipeline_mode<synchronous>, transform_indices = @transform_1, window_bounds = array<i64: 8, 128, 128>}, {pipeline_mode = #tpu.pipeline_mode<synchronous>, transform_indices = @transform_2, window_bounds = array<i64: 8, 128>}, {transform_indices = @transform_3, window_bounds = array<i64: 128, 128>}]} {
    %c0 = arith.constant 0 : index
    %c0_0 = arith.constant 0 : index
    %0 = vector.load %arg1[%c0, %c0_0] : memref<128x128xf32, #tpu.memory_space<vmem>>, vector<128x128xf32>
    %c0_1 = arith.constant 0 : index
    %c0_2 = arith.constant 0 : index
    %c0_3 = arith.constant 0 : index
    %1 = vector.load %arg2[%c0_1, %c0_2, %c0_3] : memref<8x128x128xbf16, #tpu.memory_space<vmem>>, vector<1x128x128xbf16>
    %2 = vector.shape_cast %1 : vector<1x128x128xbf16> to vector<128x128xbf16>
    %c0_4 = arith.constant 0 : index
    %c0_5 = arith.constant 0 : index
    %3 = vector.load %arg3[%c0_4, %c0_5] : memref<8x128xf32, #tpu.memory_space<vmem>>, vector<1x128xf32>
    %4 = arith.truncf %0 : vector<128x128xf32> to vector<128x128xbf16>
    %cst = arith.constant dense<0.000000e+00> : vector<128x128xf32>
    %5 = tpu.matmul %4, %2, %cst {dimension_numbers = #tpu.dot_dimension_numbers<[1], [0], [0], [1], [0, 0, 1, 1], [], []>} : vector<128x128xbf16>, vector<128x128xbf16>, vector<128x128xf32> -> vector<128x128xf32>
    %6 = vector.broadcast %3 : vector<1x128xf32> to vector<128x128xf32>
    %7 = arith.addf %5, %6 : vector<128x128xf32>
    %cst_6 = arith.constant 0.000000e+00 : f32
    %8 = vector.broadcast %cst_6 : f32 to vector<128x128xf32>
    %9 = arith.maximumf %7, %8 : vector<128x128xf32>
    %c1 = arith.constant 1 : index
    %c0_7 = arith.constant 0 : index
    %c0_8 = arith.constant 0 : index
    %10 = vector.load %arg2[%c1, %c0_7, %c0_8] : memref<8x128x128xbf16, #tpu.memory_space<vmem>>, vector<1x128x128xbf16>
    %11 = vector.shape_cast %10 : vector<1x128x128xbf16> to vector<128x128xbf16>
    %c1_9 = arith.constant 1 : index
    %c0_10 = arith.constant 0 : index
    %12 = vector.load %arg3[%c1_9, %c0_10] : memref<8x128xf32, #tpu.memory_space<vmem>>, vector<1x128xf32>
    %13 = arith.truncf %9 : vector<128x128xf32> to vector<128x128xbf16>
    %cst_11 = arith.constant dense<0.000000e+00> : vector<128x128xf32>
    %14 = tpu.matmul %13, %11, %cst_11 {dimension_numbers = #tpu.dot_dimension_numbers<[1], [0], [0], [1], [0, 0, 1, 1], [], []>} : vector<128x128xbf16>, vector<128x128xbf16>, vector<128x128xf32> -> vector<128x128xf32>
    %15 = vector.broadcast %12 : vector<1x128xf32> to vector<128x128xf32>
    %16 = arith.addf %14, %15 : vector<128x128xf32>
    %cst_12 = arith.constant 0.000000e+00 : f32
    %17 = vector.broadcast %cst_12 : f32 to vector<128x128xf32>
    %18 = arith.maximumf %16, %17 : vector<128x128xf32>
    %c2 = arith.constant 2 : index
    %c0_13 = arith.constant 0 : index
    %c0_14 = arith.constant 0 : index
    %19 = vector.load %arg2[%c2, %c0_13, %c0_14] : memref<8x128x128xbf16, #tpu.memory_space<vmem>>, vector<1x128x128xbf16>
    %20 = vector.shape_cast %19 : vector<1x128x128xbf16> to vector<128x128xbf16>
    %c2_15 = arith.constant 2 : index
    %c0_16 = arith.constant 0 : index
    %21 = vector.load %arg3[%c2_15, %c0_16] : memref<8x128xf32, #tpu.memory_space<vmem>>, vector<1x128xf32>
    %22 = arith.truncf %18 : vector<128x128xf32> to vector<128x128xbf16>
    %cst_17 = arith.constant dense<0.000000e+00> : vector<128x128xf32>
    %23 = tpu.matmul %22, %20, %cst_17 {dimension_numbers = #tpu.dot_dimension_numbers<[1], [0], [0], [1], [0, 0, 1, 1], [], []>} : vector<128x128xbf16>, vector<128x128xbf16>, vector<128x128xf32> -> vector<128x128xf32>
    %24 = vector.broadcast %21 : vector<1x128xf32> to vector<128x128xf32>
    %25 = arith.addf %23, %24 : vector<128x128xf32>
    %cst_18 = arith.constant 0.000000e+00 : f32
    %26 = vector.broadcast %cst_18 : f32 to vector<128x128xf32>
    %27 = arith.maximumf %25, %26 : vector<128x128xf32>
    %c3 = arith.constant 3 : index
    %c0_19 = arith.constant 0 : index
    %c0_20 = arith.constant 0 : index
    %28 = vector.load %arg2[%c3, %c0_19, %c0_20] : memref<8x128x128xbf16, #tpu.memory_space<vmem>>, vector<1x128x128xbf16>
    %29 = vector.shape_cast %28 : vector<1x128x128xbf16> to vector<128x128xbf16>
    %c3_21 = arith.constant 3 : index
    %c0_22 = arith.constant 0 : index
    %30 = vector.load %arg3[%c3_21, %c0_22] : memref<8x128xf32, #tpu.memory_space<vmem>>, vector<1x128xf32>
    %31 = arith.truncf %27 : vector<128x128xf32> to vector<128x128xbf16>
    %cst_23 = arith.constant dense<0.000000e+00> : vector<128x128xf32>
    %32 = tpu.matmul %31, %29, %cst_23 {dimension_numbers = #tpu.dot_dimension_numbers<[1], [0], [0], [1], [0, 0, 1, 1], [], []>} : vector<128x128xbf16>, vector<128x128xbf16>, vector<128x128xf32> -> vector<128x128xf32>
    %33 = vector.broadcast %30 : vector<1x128xf32> to vector<128x128xf32>
    %34 = arith.addf %32, %33 : vector<128x128xf32>
    %c4 = arith.constant 4 : index
    %c0_24 = arith.constant 0 : index
    %c0_25 = arith.constant 0 : index
    %35 = vector.load %arg2[%c4, %c0_24, %c0_25] : memref<8x128x128xbf16, #tpu.memory_space<vmem>>, vector<1x128x128xbf16>
    %36 = vector.shape_cast %35 : vector<1x128x128xbf16> to vector<128x128xbf16>
    %c4_26 = arith.constant 4 : index
    %c0_27 = arith.constant 0 : index
    %37 = vector.load %arg3[%c4_26, %c0_27] : memref<8x128xf32, #tpu.memory_space<vmem>>, vector<1x128xf32>
    %38 = arith.truncf %34 : vector<128x128xf32> to vector<128x128xbf16>
    %cst_28 = arith.constant dense<0.000000e+00> : vector<128x128xf32>
    %39 = tpu.matmul %38, %36, %cst_28 {dimension_numbers = #tpu.dot_dimension_numbers<[1], [0], [0], [1], [0, 0, 1, 1], [], []>} : vector<128x128xbf16>, vector<128x128xbf16>, vector<128x128xf32> -> vector<128x128xf32>
    %40 = vector.broadcast %37 : vector<1x128xf32> to vector<128x128xf32>
    %41 = arith.addf %39, %40 : vector<128x128xf32>
    %cst_29 = arith.constant 0.000000e+00 : f32
    %42 = vector.broadcast %cst_29 : f32 to vector<128x128xf32>
    %43 = arith.maximumf %41, %42 : vector<128x128xf32>
    %c5 = arith.constant 5 : index
    %c0_30 = arith.constant 0 : index
    %c0_31 = arith.constant 0 : index
    %44 = vector.load %arg2[%c5, %c0_30, %c0_31] : memref<8x128x128xbf16, #tpu.memory_space<vmem>>, vector<1x128x128xbf16>
    %45 = vector.shape_cast %44 : vector<1x128x128xbf16> to vector<128x128xbf16>
    %c5_32 = arith.constant 5 : index
    %c0_33 = arith.constant 0 : index
    %46 = vector.load %arg3[%c5_32, %c0_33] : memref<8x128xf32, #tpu.memory_space<vmem>>, vector<1x128xf32>
    %47 = arith.truncf %43 : vector<128x128xf32> to vector<128x128xbf16>
    %cst_34 = arith.constant dense<0.000000e+00> : vector<128x128xf32>
    %48 = tpu.matmul %47, %45, %cst_34 {dimension_numbers = #tpu.dot_dimension_numbers<[1], [0], [0], [1], [0, 0, 1, 1], [], []>} : vector<128x128xbf16>, vector<128x128xbf16>, vector<128x128xf32> -> vector<128x128xf32>
    %49 = vector.broadcast %46 : vector<1x128xf32> to vector<128x128xf32>
    %50 = arith.addf %48, %49 : vector<128x128xf32>
    %cst_35 = arith.constant 0.000000e+00 : f32
    %51 = vector.broadcast %cst_35 : f32 to vector<128x128xf32>
    %52 = arith.maximumf %50, %51 : vector<128x128xf32>
    %c6 = arith.constant 6 : index
    %c0_36 = arith.constant 0 : index
    %c0_37 = arith.constant 0 : index
    %53 = vector.load %arg2[%c6, %c0_36, %c0_37] : memref<8x128x128xbf16, #tpu.memory_space<vmem>>, vector<1x128x128xbf16>
    %54 = vector.shape_cast %53 : vector<1x128x128xbf16> to vector<128x128xbf16>
    %c6_38 = arith.constant 6 : index
    %c0_39 = arith.constant 0 : index
    %55 = vector.load %arg3[%c6_38, %c0_39] : memref<8x128xf32, #tpu.memory_space<vmem>>, vector<1x128xf32>
    %56 = arith.truncf %52 : vector<128x128xf32> to vector<128x128xbf16>
    %cst_40 = arith.constant dense<0.000000e+00> : vector<128x128xf32>
    %57 = tpu.matmul %56, %54, %cst_40 {dimension_numbers = #tpu.dot_dimension_numbers<[1], [0], [0], [1], [0, 0, 1, 1], [], []>} : vector<128x128xbf16>, vector<128x128xbf16>, vector<128x128xf32> -> vector<128x128xf32>
    %58 = vector.broadcast %55 : vector<1x128xf32> to vector<128x128xf32>
    %59 = arith.addf %57, %58 : vector<128x128xf32>
    %cst_41 = arith.constant 0.000000e+00 : f32
    %60 = vector.broadcast %cst_41 : f32 to vector<128x128xf32>
    %61 = arith.maximumf %59, %60 : vector<128x128xf32>
    %c7 = arith.constant 7 : index
    %c0_42 = arith.constant 0 : index
    %c0_43 = arith.constant 0 : index
    %62 = vector.load %arg2[%c7, %c0_42, %c0_43] : memref<8x128x128xbf16, #tpu.memory_space<vmem>>, vector<1x128x128xbf16>
    %63 = vector.shape_cast %62 : vector<1x128x128xbf16> to vector<128x128xbf16>
    %c7_44 = arith.constant 7 : index
    %c0_45 = arith.constant 0 : index
    %64 = vector.load %arg3[%c7_44, %c0_45] : memref<8x128xf32, #tpu.memory_space<vmem>>, vector<1x128xf32>
    %65 = arith.truncf %61 : vector<128x128xf32> to vector<128x128xbf16>
    %cst_46 = arith.constant dense<0.000000e+00> : vector<128x128xf32>
    %66 = tpu.matmul %65, %63, %cst_46 {dimension_numbers = #tpu.dot_dimension_numbers<[1], [0], [0], [1], [0, 0, 1, 1], [], []>} : vector<128x128xbf16>, vector<128x128xbf16>, vector<128x128xf32> -> vector<128x128xf32>
    %67 = vector.broadcast %64 : vector<1x128xf32> to vector<128x128xf32>
    %68 = arith.addf %66, %67 : vector<128x128xf32>
    %c0_47 = arith.constant 0 : index
    %c0_48 = arith.constant 0 : index
    %69 = vector.load %arg4[%c0_47, %c0_48] : memref<128x128xf32, #tpu.memory_space<vmem>>, vector<128x128xf32>
    tpu.vector_store %arg4[%c0_47, %c0_48], %68 {strides = array<i32>} : memref<128x128xf32, #tpu.memory_space<vmem>>, vector<128x128xf32>,
    return
  }
  func.func @transform_0(%arg0: i32) -> (i32, i32) {
    %c0_i32 = arith.constant 0 : i32
    %c0_i32_0 = arith.constant 0 : i32
    return %arg0, %c0_i32 : i32, i32
  }
  func.func @transform_1(%arg0: i32) -> (i32, i32, i32) {
    %c0_i32 = arith.constant 0 : i32
    %c0_i32_0 = arith.constant 0 : i32
    %c0_i32_1 = arith.constant 0 : i32
    %c0_i32_2 = arith.constant 0 : i32
    return %c0_i32, %c0_i32_0, %c0_i32_1 : i32, i32, i32
  }
  func.func @transform_2(%arg0: i32) -> (i32, i32) {
    %c0_i32 = arith.constant 0 : i32
    %c0_i32_0 = arith.constant 0 : i32
    %c0_i32_1 = arith.constant 0 : i32
    return %c0_i32, %c0_i32_0 : i32, i32
  }
  func.func @transform_3(%arg0: i32) -> (i32, i32) {
    %c0_i32 = arith.constant 0 : i32
    %c0_i32_0 = arith.constant 0 : i32
    return %arg0, %c0_i32 : i32, i32
  }
}

</mosaic_0001>

<bundles_post_ra>
// kernel: autoencoder_forward.1
= control target key start
LH: loop header
LB: loop body
LE: loop exit
PB: predicated region body
PF: predicated region fallthrough
CT: control target
= control target key end

     0   :  { %8 = vsyncpa [#allocation3], 0  ;;  %s2108_s12 = smov [#allocation2]   ;;  %s2263_s0 = inlined_call_operand.vmem [shape: f32[128,128], index: 0, kind: input, shape index: {}]   ;;  %s2264_s1 = inlined_call_operand.hbm [shape: bf16[8,128,128], index: 1, kind: input, shape index: {}]   ;;  %s2265_s2 = inlined_call_operand.vmem [shape: f32[8,128], index: 2, kind: input, shape index: {}]   ;;  %s2266_s3 = inlined_call_operand.vmem [shape: f32[128,128], index: 3, kind: output, shape index: {}]  }
   0x1   :  { %s16_s13 = sshll.u32 %s2108_s12, 4  ;;  %s2084_s16 = scalar_lea.hbm %s2264_s1, 8192  ;;  %s17_s13 = int_to_ptr.vmem [resolvable:$true] %s16_s13 }
   0x2   :  { %p2085_p0 = scmp.ne.s32.totalorder %s2264_s1, %s2084_s16  ;;  %p2088_p1 = scmp.lt.u32.totalorder %s2084_s16, %s2264_s1 }
   0x4   :  { %p2090_p2 = pnand %p2088_p1, %p2085_p0 }
   0x6   :  { %2093 = shalt.err (!%p2090_p2)
}
   0x7   :  { %s2094_s21 = scalar_lea.vmem %s17_s13, 8192  ;;  %p2099_p4 = scmp.lt.s32.totalorder %s17_s13, %s17_s13 }
   0x8   :  { %p2095_p3 = scmp.ne.s32.totalorder %s17_s13, %s2094_s21  ;;  %p2100_p5 = scmp.lt.s32.totalorder %s2094_s21, %s2094_s21 }
   0xa   :  { %p2101_p6 = por %p2100_p5, %p2099_p4 }
   0xc   :  { %p2102_p7 = pnand %p2101_p6, %p2095_p3 }
   0xe   :  { %2105 = shalt.err (!%p2102_p7)
}
   0xf   :  { %s2109_s22 = smov 64   ;;  %s2110_s23 = smov 4  }
  0x10   :  { %22 = dma.hbm_to_vmem [thread:$0]  %s2264_s1, 8192, %s17_s13, [#allocation3], %s2109_s22, %s2109_s22, %s2110_s23  }
  0x11   :  { %2106 = dma.done.wait [#allocation3], 8192  }
  0x12   :  { %2107 = vsyncadd [#allocation3], 4294959104  ;;  %v2020_v0 = vld [vmem:[#allocation2] sm:$0xff]   ;;  %v2021_v1 = vld [vmem:[#allocation2 + $0x8] sm:$0xff]  }
  0x13   :  { %1761 = vmatprep.subr.bf16.mxu0 %v2020_v0  ;;  %v2022_v2 = vld [vmem:[#allocation2 + $0x10] sm:$0xff]   ;;  %v2023_v3 = vld [vmem:[#allocation2 + $0x18] sm:$0xff]   ;;  %v29_v4 = vld [vmem:[%s2263_s0] sm:$0xff] }
  0x14   :  { %1762 = vmatpush3.bf16.msra.mxu0 %v2020_v0  ;;  %v30_v5 = vld [vmem:[%s2263_s0 + $0x8] sm:$0xff]  ;;  %v2024_v7 = vld [vmem:[#allocation2 + $0x20] sm:$0xff]   ;;  %v2030_v11 = vld [vmem:[#allocation2 + $0x50] sm:$0xff]  }
  0x15   :  { %1763 = vmatprep.subr.bf16.mxu0 %v2021_v1  ;;  %v62_v6 = vpack.c.bf16 %v30_v5, %v29_v4  ;;  %v2028_v8 = vld [vmem:[#allocation2 + $0x40] sm:$0xff]   ;;  %v2029_v9 = vld [vmem:[#allocation2 + $0x48] sm:$0xff]   ;;  %v2026_v12 = vld [vmem:[#allocation2 + $0x30] sm:$0xff]  }
  0x16   :  { %v2025_v10 = vld [vmem:[#allocation2 + $0x28] sm:$0xff]   ;;  %1793 = vmatprep.subr.bf16.mxu1 %v2028_v8  ;;  %v2031_v13 = vld [vmem:[#allocation2 + $0x58] sm:$0xff]   ;;  %v2032_v15 = vld [vmem:[#allocation2 + $0x60] sm:$0xff]  }
  0x17   :  { %1777 = vmatprep.mubr.bf16.mxu0 %v62_v6  ;;  %1794 = vmatpush3.bf16.msra.mxu1 %v2028_v8  ;;  %v2027_v14 = vld [vmem:[#allocation2 + $0x38] sm:$0xff]   ;;  %v31_v16 = vld [vmem:[%s2263_s0 + $0x10] sm:$0xff]  ;;  %v33_v18 = vld [vmem:[%s2263_s0 + $0x20] sm:$0xff] }
  0x18   :  { %1764 = vmatpush3.bf16.msra.mxu0 %v2021_v1  ;;  %1795 = vmatprep.subr.bf16.mxu1 %v2029_v9  ;;  %v32_v17 = vld [vmem:[%s2263_s0 + $0x18] sm:$0xff]  ;;  %v34_v19 = vld [vmem:[%s2263_s0 + $0x28] sm:$0xff]  ;;  %v35_v23 = vld [vmem:[%s2263_s0 + $0x30] sm:$0xff] }
  0x19   :  { %1765 = vmatprep.subr.bf16.mxu0 %v2022_v2  ;;  %v2033_v20 = vld [vmem:[#allocation2 + $0x68] sm:$0xff]   ;;  %v63_v21 = vpack.c.bf16 %v32_v17, %v31_v16  ;;  %v64_v22 = vpack.c.bf16 %v34_v19, %v33_v18  ;;  %v36_v24 = vld [vmem:[%s2263_s0 + $0x38] sm:$0xff]  ;;  %v37_v25 = vld [vmem:[%s2263_s0 + $0x40] sm:$0xff] }
  0x1a   :  { %v38_v26 = vld [vmem:[%s2263_s0 + $0x48] sm:$0xff]  ;;  %v65_v27 = vpack.c.bf16 %v36_v24, %v35_v23  ;;  %v39_v29 = vld [vmem:[%s2263_s0 + $0x50] sm:$0xff]  ;;  %v40_v30 = vld [vmem:[%s2263_s0 + $0x58] sm:$0xff] }
  0x1b   :  { %1796 = vmatpush3.bf16.msra.mxu1 %v2029_v9  ;;  %v66_v28 = vpack.c.bf16 %v38_v26, %v37_v25  ;;  %v41_v31 = vld [vmem:[%s2263_s0 + $0x60] sm:$0xff]  ;;  %v42_v32 = vld [vmem:[%s2263_s0 + $0x68] sm:$0xff]  ;;  %v67_v33 = vpack.c.bf16 %v40_v30, %v39_v29  ;;  %v43_v35 = vld [vmem:[%s2263_s0 + $0x70] sm:$0xff] }
  0x1c   :  { %1766 = vmatpush3.bf16.msra.mxu0 %v2022_v2  ;;  %1797 = vmatprep.subr.bf16.mxu1 %v2030_v11  ;;  %v68_v34 = vpack.c.bf16 %v42_v32, %v41_v31  ;;  %v44_v36 = vld [vmem:[%s2263_s0 + $0x78] sm:$0xff]  ;;  %v2034_v38 = vld [vmem:[#allocation2 + $0x70] sm:$0xff]   ;;  %v2036_v40 = vld [vmem:[#allocation2 + $0x80] sm:$0xff]  }
  0x1d   :  { %1767 = vmatprep.subr.bf16.mxu0 %v2023_v3  ;;  %v69_v37 = vpack.c.bf16 %v44_v36, %v43_v35  ;;  %v2035_v39 = vld [vmem:[#allocation2 + $0x78] sm:$0xff]   ;;  %v2037_v41 = vld [vmem:[#allocation2 + $0x88] sm:$0xff]   ;;  %v2038_v42 = vld [vmem:[#allocation2 + $0x90] sm:$0xff]  }
  0x1e   :  { %v2039_v43 = vld [vmem:[#allocation2 + $0x98] sm:$0xff]   ;;  %v2040_v44 = vld [vmem:[#allocation2 + $0xa0] sm:$0xff]   ;;  %v2041_v45 = vld [vmem:[#allocation2 + $0xa8] sm:$0xff]  }
  0x1f   :  { %1798 = vmatpush3.bf16.msra.mxu1 %v2030_v11  ;;  %v1561_v46 = vld [vmem:[%s2265_s2] ss:$0 sm:$0xff] }
  0x20   :  { %1768 = vmatpush3.bf16.msra.mxu0 %v2023_v3  ;;  %1799 = vmatprep.subr.bf16.mxu1 %v2031_v13 }
  0x21   :  { %1769 = vmatprep.subr.bf16.mxu0 %v2024_v7 }
  0x23   :  { %1800 = vmatpush3.bf16.msra.mxu1 %v2031_v13 }
  0x24   :  { %1770 = vmatpush3.bf16.msra.mxu0 %v2024_v7  ;;  %1801 = vmatprep.subr.bf16.mxu1 %v2032_v15 }
  0x25   :  { %1771 = vmatprep.subr.bf16.mxu0 %v2025_v10 }
  0x27   :  { %1802 = vmatpush3.bf16.msra.mxu1 %v2032_v15 }
  0x28   :  { %1772 = vmatpush3.bf16.msra.mxu0 %v2025_v10  ;;  %1803 = vmatprep.subr.bf16.mxu1 %v2033_v20 }
  0x29   :  { %1773 = vmatprep.subr.bf16.mxu0 %v2026_v12 }
  0x2b   :  { %1804 = vmatpush3.bf16.msra.mxu1 %v2033_v20 }
  0x2c   :  { %1774 = vmatpush3.bf16.msra.mxu0 %v2026_v12  ;;  %1805 = vmatprep.subr.bf16.mxu1 %v2034_v38 }
  0x2d   :  { %1775 = vmatprep.subr.bf16.mxu0 %v2027_v14 }
  0x2f   :  { %1806 = vmatpush3.bf16.msra.mxu1 %v2034_v38 }
  0x30   :  { %1776 = vmatpush3.bf16.msra.mxu0 %v2027_v14  ;;  %1807 = vmatprep.subr.bf16.mxu1 %v2035_v39 }
  0x31   :  { %1825 = vmatprep.subr.bf16.mxu0 %v2036_v40 }
  0x33   :  { %1778 = vmatmul.mubr.bf16.vlgmr.msra.gmra.mrb[0].mxu0 %v63_v21  ;;  %1808 = vmatpush3.bf16.msra.mxu1 %v2035_v39  ;;  %v2042_v39 = vld [vmem:[#allocation2 + $0xb0] sm:$0xff]  }
  0x34   :  { %1781 = vmatprep.mubr.bf16.mxu0 %v64_v22  ;;  %1826 = vmatpush3.bf16.msra.mxu0 %v2036_v40  ;;  %v2043_v40 = vld [vmem:[#allocation2 + $0xb8] sm:$0xff]  }
  0x35   :  { %1827 = vmatprep.subr.bf16.mxu0 %v2037_v41 }
  0x38   :  { %1828 = vmatpush3.bf16.msra.mxu0 %v2037_v41  ;;  %v2044_v41 = vld [vmem:[#allocation2 + $0xc0] sm:$0xff]  }
  0x39   :  { %1829 = vmatprep.subr.bf16.mxu0 %v2038_v42  ;;  %1857 = vmatprep.subr.bf16.mxu1 %v2044_v41 }
  0x3b   :  { %1782 = vmatmul.mubr.bf16.gmra.mrb[4].mxu0 %v65_v27 }
  0x3c   :  { %1785 = vmatprep.mubr.bf16.mxu0 %v66_v28  ;;  %1830 = vmatpush3.bf16.msra.mxu0 %v2038_v42  ;;  %v2045_v42 = vld [vmem:[#allocation2 + $0xc8] sm:$0xff]  }
  0x3d   :  { %1831 = vmatprep.subr.bf16.mxu0 %v2039_v43 }
  0x40   :  { %1832 = vmatpush3.bf16.msra.mxu0 %v2039_v43  ;;  %v2046_v43 = vld [vmem:[#allocation2 + $0xd0] sm:$0xff]  }
  0x41   :  { %1833 = vmatprep.subr.bf16.mxu0 %v2040_v44 }
  0x43   :  { %1786 = vmatmul.mubr.bf16.gmra.mrb[8].mxu0 %v67_v33 }
  0x44   :  { %1789 = vmatprep.mubr.bf16.mxu0 %v68_v34  ;;  %1834 = vmatpush3.bf16.msra.mxu0 %v2040_v44  ;;  %v2047_v44 = vld [vmem:[#allocation2 + $0xd8] sm:$0xff]  }
  0x45   :  { %1835 = vmatprep.subr.bf16.mxu0 %v2041_v45 }
  0x48   :  { %1836 = vmatpush3.bf16.msra.mxu0 %v2041_v45  ;;  %v2048_v45 = vld [vmem:[#allocation2 + $0xe0] sm:$0xff]  }
  0x49   :  { %1837 = vmatprep.subr.bf16.mxu0 %v2042_v39 }
  0x4b   :  { %1790 = vmatmul.mubr.bf16.gmra.mrb[12].mxu0 %v69_v37 }
  0x4c   :  { %1838 = vmatpush3.bf16.msra.mxu0 %v2042_v39 }
  0x4d   :  { %1839 = vmatprep.subr.bf16.mxu0 %v2043_v40 }
  0x50   :  { %1840 = vmatpush3.bf16.msra.mxu0 %v2043_v40  ;;  %v2050_v40 = vld [vmem:[#allocation2 + $0xf0] sm:$0xff]  }
 0x106   :  { %v1779_v47 = vpop.f32.mrb[0].mxu0 }
 0x107   :  { %v165_v48 = vadd.f32 %v1779_v47, %v1561_v46  ;;  %v156_v49 = vpop.f32.mrb[1].mxu0  ;;  %v1570_v47 = vld [vmem:[%s2265_s2 + $0x1] ss:$0 sm:$0xff] }
 0x108   :  { %v157_v50 = vadd.f32 %v1561_v46, %v156_v49  ;;  %v1780_v51 = vpop.f32.mrb[2].mxu0 }
 0x109   :  { %v168_v52 = vadd.f32 %v1780_v51, %v1561_v46  ;;  %v159_v53 = vpop.f32.mrb[3].mxu0  ;;  %v221_v55 = vmax.f32 %v165_v48, 0.0 }
 0x10a   :  { %v160_v54 = vadd.f32 %v1561_v46, %v159_v53  ;;  %v219_v57 = vmax.f32 %v157_v50, 0.0 }
 0x10b   :  { %v222_v56 = vmax.f32 %v168_v52, 0.0 }
 0x10c   :  { %v220_v58 = vmax.f32 %v160_v54, 0.0 }
 0x10d   :  { %v254_v59 = vpack.c.bf16 %v222_v56, %v221_v55 }
 0x10e   :  { %v1783_v60 = vpop.f32.mrb[4].mxu0  ;;  %v253_v61 = vpack.c.bf16 %v220_v58, %v219_v57 }
 0x10f   :  { %v181_v62 = vadd.f32 %v1783_v60, %v1561_v46  ;;  %v172_v63 = vpop.f32.mrb[5].mxu0 }
 0x110   :  { %v173_v0 = vadd.f32 %v1561_v46, %v172_v63  ;;  %v1784_v1 = vpop.f32.mrb[6].mxu0  ;;  %1809 = vmatprep.mubr.bf16.mxu1 %v253_v61 }
 0x111   :  { %v184_v2 = vadd.f32 %v1784_v1, %v1561_v46  ;;  %v175_v3 = vpop.f32.mrb[7].mxu0  ;;  %1810 = vmatmul.mubr.bf16.vlgmr.msra.gmra.mrb[0].mxu1 %v254_v59  ;;  %v225_v5 = vmax.f32 %v181_v62, 0.0 }
 0x112   :  { %v176_v4 = vadd.f32 %v1561_v46, %v175_v3  ;;  %v223_v7 = vmax.f32 %v173_v0, 0.0  ;;  %1858 = vmatpush3.bf16.msra.mxu1 %v2044_v41  ;;  %v2051_v41 = vld [vmem:[#allocation2 + $0xf8] sm:$0xff]  }
 0x113   :  { %v226_v6 = vmax.f32 %v184_v2, 0.0  ;;  %1859 = vmatprep.subr.bf16.mxu1 %v2045_v42 }
 0x114   :  { %v224_v8 = vmax.f32 %v176_v4, 0.0 }
 0x115   :  { %v256_v9 = vpack.c.bf16 %v226_v6, %v225_v5 }
 0x116   :  { %v255_v10 = vpack.c.bf16 %v224_v8, %v223_v7  ;;  %v1787_v11 = vpop.f32.mrb[8].mxu0  ;;  %1860 = vmatpush3.bf16.msra.mxu1 %v2045_v42  ;;  %v2052_v42 = vld [vmem:[#allocation2 + $0x100] sm:$0xff]  }
 0x117   :  { %v197_v12 = vadd.f32 %v1787_v11, %v1561_v46  ;;  %v188_v13 = vpop.f32.mrb[9].mxu0  ;;  %1861 = vmatprep.subr.bf16.mxu1 %v2046_v43  ;;  %1889 = vmatprep.subr.bf16.mxu0 %v2052_v42 }
 0x118   :  { %v189_v14 = vadd.f32 %v1561_v46, %v188_v13  ;;  %v1788_v15 = vpop.f32.mrb[10].mxu0  ;;  %1813 = vmatprep.mubr.bf16.mxu1 %v255_v10 }
 0x119   :  { %v200_v16 = vadd.f32 %v1788_v15, %v1561_v46  ;;  %v191_v17 = vpop.f32.mrb[11].mxu0  ;;  %1814 = vmatmul.mubr.bf16.gmra.mrb[4].mxu1 %v256_v9  ;;  %v229_v19 = vmax.f32 %v197_v12, 0.0 }
 0x11a   :  { %v192_v18 = vadd.f32 %v1561_v46, %v191_v17  ;;  %v227_v21 = vmax.f32 %v189_v14, 0.0  ;;  %1862 = vmatpush3.bf16.msra.mxu1 %v2046_v43  ;;  %v2053_v43 = vld [vmem:[#allocation2 + $0x108] sm:$0xff]  }
 0x11b   :  { %v230_v20 = vmax.f32 %v200_v16, 0.0  ;;  %1863 = vmatprep.subr.bf16.mxu1 %v2047_v44 }
 0x11c   :  { %v228_v22 = vmax.f32 %v192_v18, 0.0 }
 0x11d   :  { %v258_v23 = vpack.c.bf16 %v230_v20, %v229_v19 }
 0x11e   :  { %v257_v24 = vpack.c.bf16 %v228_v22, %v227_v21  ;;  %v1791_v25 = vpop.f32.mrb[12].mxu0  ;;  %1864 = vmatpush3.bf16.msra.mxu1 %v2047_v44  ;;  %v2054_v44 = vld [vmem:[#allocation2 + $0x110] sm:$0xff]  }
 0x11f   :  { %v213_v26 = vadd.f32 %v1791_v25, %v1561_v46  ;;  %v204_v27 = vpop.f32.mrb[13].mxu0  ;;  %1865 = vmatprep.subr.bf16.mxu1 %v2048_v45 }
 0x120   :  { %v205_v28 = vadd.f32 %v1561_v46, %v204_v27  ;;  %v1792_v29 = vpop.f32.mrb[14].mxu0  ;;  %1817 = vmatprep.mubr.bf16.mxu1 %v257_v24 }
 0x121   :  { %v216_v30 = vadd.f32 %v1792_v29, %v1561_v46  ;;  %v207_v31 = vpop.f32.mrb[15].mxu0  ;;  %1818 = vmatmul.mubr.bf16.gmra.mrb[8].mxu1 %v258_v23  ;;  %v233_v33 = vmax.f32 %v213_v26, 0.0 }
 0x122   :  { %v208_v32 = vadd.f32 %v1561_v46, %v207_v31  ;;  %v231_v35 = vmax.f32 %v205_v28, 0.0  ;;  %v2049_v46 = vld [vmem:[#allocation2 + $0xe8] sm:$0xff]   ;;  %1866 = vmatpush3.bf16.msra.mxu1 %v2048_v45  ;;  %v2055_v45 = vld [vmem:[#allocation2 + $0x118] sm:$0xff]  }
 0x123   :  { %v234_v34 = vmax.f32 %v216_v30, 0.0  ;;  %1867 = vmatprep.subr.bf16.mxu1 %v2049_v46 }
 0x124   :  { %v232_v36 = vmax.f32 %v208_v32, 0.0 }
 0x125   :  { %v260_v37 = vpack.c.bf16 %v234_v34, %v233_v33 }
 0x126   :  { %v259_v38 = vpack.c.bf16 %v232_v36, %v231_v35  ;;  %1868 = vmatpush3.bf16.msra.mxu1 %v2049_v46  ;;  %v2056_v46 = vld [vmem:[#allocation2 + $0x120] sm:$0xff]  }
 0x127   :  { %1869 = vmatprep.subr.bf16.mxu1 %v2050_v40 }
 0x128   :  { %1821 = vmatprep.mubr.bf16.mxu1 %v259_v38 }
 0x129   :  { %1822 = vmatmul.mubr.bf16.gmra.mrb[12].mxu1 %v260_v37 }
 0x12a   :  { %1870 = vmatpush3.bf16.msra.mxu1 %v2050_v40 }
 0x12b   :  { %1871 = vmatprep.subr.bf16.mxu1 %v2051_v41 }
 0x12e   :  { %1872 = vmatpush3.bf16.msra.mxu1 %v2051_v41  ;;  %v2058_v41 = vld [vmem:[#allocation2 + $0x130] sm:$0xff]  }
 0x1e4   :  { %v1811_v48 = vpop.f32.mrb[0].mxu1 }
 0x1e5   :  { %v356_v49 = vadd.f32 %v1811_v48, %v1570_v47  ;;  %v347_v50 = vpop.f32.mrb[1].mxu1  ;;  %v1579_v48 = vld [vmem:[%s2265_s2 + $0x2] ss:$0 sm:$0xff] }
 0x1e6   :  { %v348_v51 = vadd.f32 %v1570_v47, %v347_v50  ;;  %v1812_v52 = vpop.f32.mrb[2].mxu1 }
 0x1e7   :  { %v359_v53 = vadd.f32 %v1812_v52, %v1570_v47  ;;  %v350_v54 = vpop.f32.mrb[3].mxu1  ;;  %v412_v56 = vmax.f32 %v356_v49, 0.0 }
 0x1e8   :  { %v351_v55 = vadd.f32 %v1570_v47, %v350_v54  ;;  %v410_v58 = vmax.f32 %v348_v51, 0.0 }
 0x1e9   :  { %v413_v57 = vmax.f32 %v359_v53, 0.0 }
 0x1ea   :  { %v411_v59 = vmax.f32 %v351_v55, 0.0 }
 0x1eb   :  { %v445_v60 = vpack.c.bf16 %v413_v57, %v412_v56 }
 0x1ec   :  { %v444_v61 = vpack.c.bf16 %v411_v59, %v410_v58  ;;  %v1815_v62 = vpop.f32.mrb[4].mxu1 }
 0x1ed   :  { %v372_v63 = vadd.f32 %v1815_v62, %v1570_v47  ;;  %v363_v0 = vpop.f32.mrb[5].mxu1 }
 0x1ee   :  { %v364_v1 = vadd.f32 %v1570_v47, %v363_v0  ;;  %v1816_v2 = vpop.f32.mrb[6].mxu1  ;;  %1841 = vmatprep.mubr.bf16.mxu0 %v444_v61 }
 0x1ef   :  { %v375_v3 = vadd.f32 %v1816_v2, %v1570_v47  ;;  %v366_v4 = vpop.f32.mrb[7].mxu1  ;;  %1842 = vmatmul.mubr.bf16.vlgmr.msra.gmra.mrb[16].mxu0 %v445_v60  ;;  %v416_v6 = vmax.f32 %v372_v63, 0.0 }
 0x1f0   :  { %v367_v5 = vadd.f32 %v1570_v47, %v366_v4  ;;  %v414_v8 = vmax.f32 %v364_v1, 0.0  ;;  %1890 = vmatpush3.bf16.msra.mxu0 %v2052_v42  ;;  %v2059_v42 = vld [vmem:[#allocation2 + $0x138] sm:$0xff]  }
 0x1f1   :  { %v417_v7 = vmax.f32 %v375_v3, 0.0  ;;  %1891 = vmatprep.subr.bf16.mxu0 %v2053_v43 }
 0x1f2   :  { %v415_v9 = vmax.f32 %v367_v5, 0.0 }
 0x1f3   :  { %v447_v10 = vpack.c.bf16 %v417_v7, %v416_v6 }
 0x1f4   :  { %v446_v11 = vpack.c.bf16 %v415_v9, %v414_v8  ;;  %v1819_v12 = vpop.f32.mrb[8].mxu1  ;;  %1892 = vmatpush3.bf16.msra.mxu0 %v2053_v43  ;;  %v2060_v43 = vld [vmem:[#allocation2 + $0x140] sm:$0xff]  }
 0x1f5   :  { %v388_v13 = vadd.f32 %v1819_v12, %v1570_v47  ;;  %v379_v14 = vpop.f32.mrb[9].mxu1  ;;  %1893 = vmatprep.subr.bf16.mxu0 %v2054_v44  ;;  %1921 = vmatprep.subr.bf16.mxu1 %v2060_v43 }
 0x1f6   :  { %v380_v15 = vadd.f32 %v1570_v47, %v379_v14  ;;  %v1820_v16 = vpop.f32.mrb[10].mxu1  ;;  %1845 = vmatprep.mubr.bf16.mxu0 %v446_v11 }
 0x1f7   :  { %v391_v17 = vadd.f32 %v1820_v16, %v1570_v47  ;;  %v382_v18 = vpop.f32.mrb[11].mxu1  ;;  %1846 = vmatmul.mubr.bf16.gmra.mrb[20].mxu0 %v447_v10  ;;  %v420_v20 = vmax.f32 %v388_v13, 0.0 }
 0x1f8   :  { %v383_v19 = vadd.f32 %v1570_v47, %v382_v18  ;;  %v418_v22 = vmax.f32 %v380_v15, 0.0  ;;  %1894 = vmatpush3.bf16.msra.mxu0 %v2054_v44  ;;  %v2061_v44 = vld [vmem:[#allocation2 + $0x148] sm:$0xff]  }
 0x1f9   :  { %v421_v21 = vmax.f32 %v391_v17, 0.0  ;;  %1895 = vmatprep.subr.bf16.mxu0 %v2055_v45 }
 0x1fa   :  { %v419_v23 = vmax.f32 %v383_v19, 0.0 }
 0x1fb   :  { %v449_v24 = vpack.c.bf16 %v421_v21, %v420_v20 }
 0x1fc   :  { %v448_v25 = vpack.c.bf16 %v419_v23, %v418_v22  ;;  %v1823_v26 = vpop.f32.mrb[12].mxu1  ;;  %1896 = vmatpush3.bf16.msra.mxu0 %v2055_v45  ;;  %v2062_v45 = vld [vmem:[#allocation2 + $0x150] sm:$0xff]  }
 0x1fd   :  { %v404_v27 = vadd.f32 %v1823_v26, %v1570_v47  ;;  %v395_v28 = vpop.f32.mrb[13].mxu1  ;;  %1897 = vmatprep.subr.bf16.mxu0 %v2056_v46 }
 0x1fe   :  { %v396_v29 = vadd.f32 %v1570_v47, %v395_v28  ;;  %v1824_v30 = vpop.f32.mrb[14].mxu1  ;;  %1849 = vmatprep.mubr.bf16.mxu0 %v448_v25 }
 0x1ff   :  { %v407_v31 = vadd.f32 %v1824_v30, %v1570_v47  ;;  %v398_v32 = vpop.f32.mrb[15].mxu1  ;;  %1850 = vmatmul.mubr.bf16.gmra.mrb[24].mxu0 %v449_v24  ;;  %v424_v34 = vmax.f32 %v404_v27, 0.0 }
 0x200   :  { %v399_v33 = vadd.f32 %v1570_v47, %v398_v32  ;;  %v422_v36 = vmax.f32 %v396_v29, 0.0  ;;  %v2057_v47 = vld [vmem:[#allocation2 + $0x128] sm:$0xff]   ;;  %1898 = vmatpush3.bf16.msra.mxu0 %v2056_v46  ;;  %v2063_v46 = vld [vmem:[#allocation2 + $0x158] sm:$0xff]  }
 0x201   :  { %v425_v35 = vmax.f32 %v407_v31, 0.0  ;;  %1899 = vmatprep.subr.bf16.mxu0 %v2057_v47 }
 0x202   :  { %v423_v37 = vmax.f32 %v399_v33, 0.0 }
 0x203   :  { %v451_v38 = vpack.c.bf16 %v425_v35, %v424_v34 }
 0x204   :  { %v450_v39 = vpack.c.bf16 %v423_v37, %v422_v36  ;;  %1900 = vmatpush3.bf16.msra.mxu0 %v2057_v47  ;;  %v2064_v47 = vld [vmem:[#allocation2 + $0x160] sm:$0xff]  }
 0x205   :  { %1901 = vmatprep.subr.bf16.mxu0 %v2058_v41 }
 0x206   :  { %1853 = vmatprep.mubr.bf16.mxu0 %v450_v39 }
 0x207   :  { %1854 = vmatmul.mubr.bf16.gmra.mrb[28].mxu0 %v451_v38 }
 0x208   :  { %1902 = vmatpush3.bf16.msra.mxu0 %v2058_v41 }
 0x209   :  { %1903 = vmatprep.subr.bf16.mxu0 %v2059_v42 }
 0x20c   :  { %1904 = vmatpush3.bf16.msra.mxu0 %v2059_v42 }
 0x2c2   :  { %v1843_v49 = vpop.f32.mrb[16].mxu0 }
 0x2c3   :  { %v547_v50 = vadd.f32 %v1843_v49, %v1579_v48  ;;  %v538_v51 = vpop.f32.mrb[17].mxu0 }
 0x2c4   :  { %v539_v52 = vadd.f32 %v1579_v48, %v538_v51  ;;  %v1844_v53 = vpop.f32.mrb[18].mxu0 }
 0x2c5   :  { %v550_v54 = vadd.f32 %v1844_v53, %v1579_v48  ;;  %v541_v55 = vpop.f32.mrb[19].mxu0  ;;  %v603_v57 = vmax.f32 %v547_v50, 0.0  ;;  %v1588_v50 = vld [vmem:[%s2265_s2 + $0x3] ss:$0 sm:$0xff] }
 0x2c6   :  { %v542_v56 = vadd.f32 %v1579_v48, %v541_v55  ;;  %v601_v59 = vmax.f32 %v539_v52, 0.0 }
 0x2c7   :  { %v604_v58 = vmax.f32 %v550_v54, 0.0 }
 0x2c8   :  { %v602_v60 = vmax.f32 %v542_v56, 0.0 }
 0x2c9   :  { %v636_v61 = vpack.c.bf16 %v604_v58, %v603_v57 }
 0x2ca   :  { %v635_v62 = vpack.c.bf16 %v602_v60, %v601_v59  ;;  %v1847_v63 = vpop.f32.mrb[20].mxu0 }
 0x2cb   :  { %v563_v0 = vadd.f32 %v1847_v63, %v1579_v48  ;;  %v554_v1 = vpop.f32.mrb[21].mxu0 }
 0x2cc   :  { %v555_v2 = vadd.f32 %v1579_v48, %v554_v1  ;;  %v1848_v3 = vpop.f32.mrb[22].mxu0  ;;  %1873 = vmatprep.mubr.bf16.mxu1 %v635_v62 }
 0x2cd   :  { %v566_v4 = vadd.f32 %v1848_v3, %v1579_v48  ;;  %v557_v5 = vpop.f32.mrb[23].mxu0  ;;  %1874 = vmatmul.mubr.bf16.vlgmr.msra.gmra.mrb[16].mxu1 %v636_v61  ;;  %v607_v7 = vmax.f32 %v563_v0, 0.0 }
 0x2ce   :  { %v558_v6 = vadd.f32 %v1579_v48, %v557_v5  ;;  %v605_v9 = vmax.f32 %v555_v2, 0.0  ;;  %1922 = vmatpush3.bf16.msra.mxu1 %v2060_v43 }
 0x2cf   :  { %v608_v8 = vmax.f32 %v566_v4, 0.0  ;;  %1923 = vmatprep.subr.bf16.mxu1 %v2061_v44 }
 0x2d0   :  { %v606_v10 = vmax.f32 %v558_v6, 0.0 }
 0x2d1   :  { %v638_v11 = vpack.c.bf16 %v608_v8, %v607_v7 }
 0x2d2   :  { %v637_v12 = vpack.c.bf16 %v606_v10, %v605_v9  ;;  %v1851_v13 = vpop.f32.mrb[24].mxu0  ;;  %1924 = vmatpush3.bf16.msra.mxu1 %v2061_v44 }
 0x2d3   :  { %v579_v14 = vadd.f32 %v1851_v13, %v1579_v48  ;;  %v570_v15 = vpop.f32.mrb[25].mxu0  ;;  %1925 = vmatprep.subr.bf16.mxu1 %v2062_v45 }
 0x2d4   :  { %v571_v16 = vadd.f32 %v1579_v48, %v570_v15  ;;  %v1852_v17 = vpop.f32.mrb[26].mxu0  ;;  %1877 = vmatprep.mubr.bf16.mxu1 %v637_v12 }
 0x2d5   :  { %v582_v18 = vadd.f32 %v1852_v17, %v1579_v48  ;;  %v573_v19 = vpop.f32.mrb[27].mxu0  ;;  %1878 = vmatmul.mubr.bf16.gmra.mrb[20].mxu1 %v638_v11  ;;  %v611_v21 = vmax.f32 %v579_v14, 0.0 }
 0x2d6   :  { %v574_v20 = vadd.f32 %v1579_v48, %v573_v19  ;;  %v609_v23 = vmax.f32 %v571_v16, 0.0  ;;  %1926 = vmatpush3.bf16.msra.mxu1 %v2062_v45 }
 0x2d7   :  { %v612_v22 = vmax.f32 %v582_v18, 0.0  ;;  %1927 = vmatprep.subr.bf16.mxu1 %v2063_v46 }
 0x2d8   :  { %v610_v24 = vmax.f32 %v574_v20, 0.0 }
 0x2d9   :  { %v640_v25 = vpack.c.bf16 %v612_v22, %v611_v21 }
 0x2da   :  { %v639_v26 = vpack.c.bf16 %v610_v24, %v609_v23  ;;  %v1855_v27 = vpop.f32.mrb[28].mxu0  ;;  %1928 = vmatpush3.bf16.msra.mxu1 %v2063_v46 }
 0x2db   :  { %v595_v28 = vadd.f32 %v1855_v27, %v1579_v48  ;;  %v586_v29 = vpop.f32.mrb[29].mxu0  ;;  %1929 = vmatprep.subr.bf16.mxu1 %v2064_v47  ;;  %v2067_v27 = vld [vmem:[#allocation2 + $0x178] sm:$0xff]  }
 0x2dc   :  { %v587_v30 = vadd.f32 %v1579_v48, %v586_v29  ;;  %v1856_v31 = vpop.f32.mrb[30].mxu0  ;;  %1881 = vmatprep.mubr.bf16.mxu1 %v639_v26  ;;  %v2066_v26 = vld [vmem:[#allocation2 + $0x170] sm:$0xff]   ;;  %v2069_v29 = vld [vmem:[#allocation2 + $0x188] sm:$0xff]  }
 0x2dd   :  { %v598_v32 = vadd.f32 %v1856_v31, %v1579_v48  ;;  %v589_v33 = vpop.f32.mrb[31].mxu0  ;;  %1882 = vmatmul.mubr.bf16.gmra.mrb[24].mxu1 %v640_v25  ;;  %v615_v35 = vmax.f32 %v595_v28, 0.0  ;;  %v2068_v28 = vld [vmem:[#allocation2 + $0x180] sm:$0xff]   ;;  %v2071_v31 = vld [vmem:[#allocation2 + $0x198] sm:$0xff]  }
 0x2de   :  { %v590_v34 = vadd.f32 %v1579_v48, %v589_v33  ;;  %v613_v37 = vmax.f32 %v587_v30, 0.0  ;;  %v2065_v48 = vld [vmem:[#allocation2 + $0x168] sm:$0xff]   ;;  %1930 = vmatpush3.bf16.msra.mxu1 %v2064_v47  ;;  %1953 = vmatprep.subr.bf16.mxu0 %v2068_v28  ;;  %v2070_v30 = vld [vmem:[#allocation2 + $0x190] sm:$0xff]  }
 0x2df   :  { %v616_v36 = vmax.f32 %v598_v32, 0.0  ;;  %1931 = vmatprep.subr.bf16.mxu1 %v2065_v48  ;;  %v2072_v32 = vld [vmem:[#allocation2 + $0x1a0] sm:$0xff]   ;;  %v2073_v33 = vld [vmem:[#allocation2 + $0x1a8] sm:$0xff]  }
 0x2e0   :  { %v614_v38 = vmax.f32 %v590_v34, 0.0  ;;  %v1597_v34 = vld [vmem:[%s2265_s2 + $0x4] ss:$0 sm:$0xff] }
 0x2e1   :  { %v642_v39 = vpack.c.bf16 %v616_v36, %v615_v35 }
 0x2e2   :  { %v641_v40 = vpack.c.bf16 %v614_v38, %v613_v37  ;;  %1932 = vmatpush3.bf16.msra.mxu1 %v2065_v48 }
 0x2e3   :  { %1933 = vmatprep.subr.bf16.mxu1 %v2066_v26 }
 0x2e4   :  { %1885 = vmatprep.mubr.bf16.mxu1 %v641_v40 }
 0x2e5   :  { %1886 = vmatmul.mubr.bf16.gmra.mrb[28].mxu1 %v642_v39 }
 0x2e6   :  { %1934 = vmatpush3.bf16.msra.mxu1 %v2066_v26 }
 0x2e7   :  { %1935 = vmatprep.subr.bf16.mxu1 %v2067_v27 }
 0x2ea   :  { %1936 = vmatpush3.bf16.msra.mxu1 %v2067_v27  ;;  %v2074_v27 = vld [vmem:[#allocation2 + $0x1b0] sm:$0xff]  }
 0x3a0   :  { %v1875_v49 = vpop.f32.mrb[16].mxu1 }
 0x3a1   :  { %v729_v51 = vpop.f32.mrb[17].mxu1  ;;  %v738_v53 = vadd.f32 %v1875_v49, %v1588_v50 }
 0x3a2   :  { %v1876_v52 = vpop.f32.mrb[18].mxu1  ;;  %v730_v56 = vadd.f32 %v1588_v50, %v729_v51 }
 0x3a3   :  { %v741_v54 = vadd.f32 %v1876_v52, %v1588_v50  ;;  %v732_v55 = vpop.f32.mrb[19].mxu1 }
 0x3a4   :  { %v733_v57 = vadd.f32 %v1588_v50, %v732_v55 }
 0x3a5   :  { %v811_v58 = vpack.c.bf16 %v741_v54, %v738_v53 }
 0x3a6   :  { %v810_v59 = vpack.c.bf16 %v733_v57, %v730_v56 }
 0x3a8   :  { %v1879_v60 = vpop.f32.mrb[20].mxu1  ;;  %1905 = vmatprep.mubr.bf16.mxu0 %v810_v59 }
 0x3a9   :  { %v745_v61 = vpop.f32.mrb[21].mxu1  ;;  %1906 = vmatmul.mubr.bf16.vlgmr.msra.gmra.mrb[32].mxu0 %v811_v58  ;;  %v754_v63 = vadd.f32 %v1879_v60, %v1588_v50 }
 0x3aa   :  { %v1880_v62 = vpop.f32.mrb[22].mxu1  ;;  %v746_v2 = vadd.f32 %v1588_v50, %v745_v61  ;;  %1954 = vmatpush3.bf16.msra.mxu0 %v2068_v28  ;;  %v2075_v28 = vld [vmem:[#allocation2 + $0x1b8] sm:$0xff]  }
 0x3ab   :  { %v757_v0 = vadd.f32 %v1880_v62, %v1588_v50  ;;  %v748_v1 = vpop.f32.mrb[23].mxu1  ;;  %1955 = vmatprep.subr.bf16.mxu0 %v2069_v29 }
 0x3ac   :  { %v749_v3 = vadd.f32 %v1588_v50, %v748_v1 }
 0x3ad   :  { %v813_v4 = vpack.c.bf16 %v757_v0, %v754_v63 }
 0x3ae   :  { %v812_v5 = vpack.c.bf16 %v749_v3, %v746_v2  ;;  %1956 = vmatpush3.bf16.msra.mxu0 %v2069_v29  ;;  %v2076_v29 = vld [vmem:[#allocation2 + $0x1c0] sm:$0xff]  }
 0x3af   :  { %1957 = vmatprep.subr.bf16.mxu0 %v2070_v30  ;;  %1985 = vmatprep.subr.bf16.mxu1 %v2076_v29 }
 0x3b0   :  { %v1883_v6 = vpop.f32.mrb[24].mxu1  ;;  %1909 = vmatprep.mubr.bf16.mxu0 %v812_v5 }
 0x3b1   :  { %v761_v7 = vpop.f32.mrb[25].mxu1  ;;  %1910 = vmatmul.mubr.bf16.gmra.mrb[36].mxu0 %v813_v4  ;;  %v770_v9 = vadd.f32 %v1883_v6, %v1588_v50 }
 0x3b2   :  { %v1884_v8 = vpop.f32.mrb[26].mxu1  ;;  %v762_v12 = vadd.f32 %v1588_v50, %v761_v7  ;;  %1958 = vmatpush3.bf16.msra.mxu0 %v2070_v30  ;;  %v2077_v30 = vld [vmem:[#allocation2 + $0x1c8] sm:$0xff]  }
 0x3b3   :  { %v773_v10 = vadd.f32 %v1884_v8, %v1588_v50  ;;  %v764_v11 = vpop.f32.mrb[27].mxu1  ;;  %1959 = vmatprep.subr.bf16.mxu0 %v2071_v31 }
 0x3b4   :  { %v765_v13 = vadd.f32 %v1588_v50, %v764_v11 }
 0x3b5   :  { %v815_v14 = vpack.c.bf16 %v773_v10, %v770_v9 }
 0x3b6   :  { %v814_v15 = vpack.c.bf16 %v765_v13, %v762_v12  ;;  %1960 = vmatpush3.bf16.msra.mxu0 %v2071_v31  ;;  %v2078_v31 = vld [vmem:[#allocation2 + $0x1d0] sm:$0xff]  }
 0x3b7   :  { %1961 = vmatprep.subr.bf16.mxu0 %v2072_v32 }
 0x3b8   :  { %v1887_v16 = vpop.f32.mrb[28].mxu1  ;;  %1913 = vmatprep.mubr.bf16.mxu0 %v814_v15 }
 0x3b9   :  { %v777_v17 = vpop.f32.mrb[29].mxu1  ;;  %1914 = vmatmul.mubr.bf16.gmra.mrb[40].mxu0 %v815_v14  ;;  %v786_v19 = vadd.f32 %v1887_v16, %v1588_v50 }
 0x3ba   :  { %v1888_v18 = vpop.f32.mrb[30].mxu1  ;;  %v778_v22 = vadd.f32 %v1588_v50, %v777_v17  ;;  %1962 = vmatpush3.bf16.msra.mxu0 %v2072_v32  ;;  %v2079_v32 = vld [vmem:[#allocation2 + $0x1d8] sm:$0xff]  }
 0x3bb   :  { %v789_v20 = vadd.f32 %v1888_v18, %v1588_v50  ;;  %v780_v21 = vpop.f32.mrb[31].mxu1  ;;  %1963 = vmatprep.subr.bf16.mxu0 %v2073_v33 }
 0x3bc   :  { %v781_v23 = vadd.f32 %v1588_v50, %v780_v21 }
 0x3bd   :  { %v817_v24 = vpack.c.bf16 %v789_v20, %v786_v19 }
 0x3be   :  { %v816_v25 = vpack.c.bf16 %v781_v23, %v778_v22  ;;  %1964 = vmatpush3.bf16.msra.mxu0 %v2073_v33  ;;  %v2080_v33 = vld [vmem:[#allocation2 + $0x1e0] sm:$0xff]  }
 0x3bf   :  { %1965 = vmatprep.subr.bf16.mxu0 %v2074_v27 }
 0x3c0   :  { %1917 = vmatprep.mubr.bf16.mxu0 %v816_v25 }
 0x3c1   :  { %1918 = vmatmul.mubr.bf16.gmra.mrb[44].mxu0 %v817_v24 }
 0x3c2   :  { %1966 = vmatpush3.bf16.msra.mxu0 %v2074_v27 }
 0x3c3   :  { %1967 = vmatprep.subr.bf16.mxu0 %v2075_v28 }
 0x3c6   :  { %1968 = vmatpush3.bf16.msra.mxu0 %v2075_v28  ;;  %v2082_v28 = vld [vmem:[#allocation2 + $0x1f0] sm:$0xff]  }
 0x47c   :  { %v1907_v35 = vpop.f32.mrb[32].mxu0 }
 0x47d   :  { %v913_v36 = vadd.f32 %v1907_v35, %v1597_v34  ;;  %v904_v37 = vpop.f32.mrb[33].mxu0  ;;  %v1606_v35 = vld [vmem:[%s2265_s2 + $0x5] ss:$0 sm:$0xff] }
 0x47e   :  { %v905_v38 = vadd.f32 %v1597_v34, %v904_v37  ;;  %v1908_v39 = vpop.f32.mrb[34].mxu0 }
 0x47f   :  { %v916_v40 = vadd.f32 %v1908_v39, %v1597_v34  ;;  %v907_v41 = vpop.f32.mrb[35].mxu0  ;;  %v969_v43 = vmax.f32 %v913_v36, 0.0 }
 0x480   :  { %v908_v42 = vadd.f32 %v1597_v34, %v907_v41  ;;  %v967_v45 = vmax.f32 %v905_v38, 0.0 }
 0x481   :  { %v970_v44 = vmax.f32 %v916_v40, 0.0 }
 0x482   :  { %v968_v46 = vmax.f32 %v908_v42, 0.0 }
 0x483   :  { %v1002_v47 = vpack.c.bf16 %v970_v44, %v969_v43 }
 0x484   :  { %v1001_v48 = vpack.c.bf16 %v968_v46, %v967_v45  ;;  %v1911_v49 = vpop.f32.mrb[36].mxu0 }
 0x485   :  { %v929_v50 = vadd.f32 %v1911_v49, %v1597_v34  ;;  %v920_v51 = vpop.f32.mrb[37].mxu0 }
 0x486   :  { %v921_v52 = vadd.f32 %v1597_v34, %v920_v51  ;;  %v1912_v53 = vpop.f32.mrb[38].mxu0  ;;  %1937 = vmatprep.mubr.bf16.mxu1 %v1001_v48 }
 0x487   :  { %v932_v54 = vadd.f32 %v1912_v53, %v1597_v34  ;;  %v923_v55 = vpop.f32.mrb[39].mxu0  ;;  %1938 = vmatmul.mubr.bf16.vlgmr.msra.gmra.mrb[32].mxu1 %v1002_v47  ;;  %v973_v57 = vmax.f32 %v929_v50, 0.0 }
 0x488   :  { %v924_v56 = vadd.f32 %v1597_v34, %v923_v55  ;;  %v971_v59 = vmax.f32 %v921_v52, 0.0  ;;  %1986 = vmatpush3.bf16.msra.mxu1 %v2076_v29  ;;  %v2083_v29 = vld [vmem:[#allocation2 + $0x1f8] sm:$0xff]  }
 0x489   :  { %v974_v58 = vmax.f32 %v932_v54, 0.0  ;;  %1987 = vmatprep.subr.bf16.mxu1 %v2077_v30 }
 0x48a   :  { %v972_v60 = vmax.f32 %v924_v56, 0.0 }
 0x48b   :  { %v1004_v61 = vpack.c.bf16 %v974_v58, %v973_v57 }
 0x48c   :  { %v1003_v62 = vpack.c.bf16 %v972_v60, %v971_v59  ;;  %v1915_v63 = vpop.f32.mrb[40].mxu0  ;;  %1988 = vmatpush3.bf16.msra.mxu1 %v2077_v30  ;;  %v1615_v30 = vld [vmem:[%s2265_s2 + $0x6] ss:$0 sm:$0xff] }
 0x48d   :  { %v945_v0 = vadd.f32 %v1915_v63, %v1597_v34  ;;  %v936_v1 = vpop.f32.mrb[41].mxu0  ;;  %1989 = vmatprep.subr.bf16.mxu1 %v2078_v31 }
 0x48e   :  { %v937_v2 = vadd.f32 %v1597_v34, %v936_v1  ;;  %v1916_v3 = vpop.f32.mrb[42].mxu0  ;;  %1941 = vmatprep.mubr.bf16.mxu1 %v1003_v62 }
 0x48f   :  { %v948_v4 = vadd.f32 %v1916_v3, %v1597_v34  ;;  %v939_v5 = vpop.f32.mrb[43].mxu0  ;;  %1942 = vmatmul.mubr.bf16.gmra.mrb[36].mxu1 %v1004_v61  ;;  %v977_v7 = vmax.f32 %v945_v0, 0.0 }
 0x490   :  { %v940_v6 = vadd.f32 %v1597_v34, %v939_v5  ;;  %v975_v9 = vmax.f32 %v937_v2, 0.0  ;;  %1990 = vmatpush3.bf16.msra.mxu1 %v2078_v31 }
 0x491   :  { %v978_v8 = vmax.f32 %v948_v4, 0.0  ;;  %1991 = vmatprep.subr.bf16.mxu1 %v2079_v32 }
 0x492   :  { %v976_v10 = vmax.f32 %v940_v6, 0.0 }
 0x493   :  { %v1006_v11 = vpack.c.bf16 %v978_v8, %v977_v7 }
 0x494   :  { %v1005_v12 = vpack.c.bf16 %v976_v10, %v975_v9  ;;  %v1919_v13 = vpop.f32.mrb[44].mxu0  ;;  %1992 = vmatpush3.bf16.msra.mxu1 %v2079_v32 }
 0x495   :  { %v961_v14 = vadd.f32 %v1919_v13, %v1597_v34  ;;  %v952_v15 = vpop.f32.mrb[45].mxu0  ;;  %1993 = vmatprep.subr.bf16.mxu1 %v2080_v33 }
 0x496   :  { %v953_v16 = vadd.f32 %v1597_v34, %v952_v15  ;;  %v1920_v17 = vpop.f32.mrb[46].mxu0  ;;  %1945 = vmatprep.mubr.bf16.mxu1 %v1005_v12 }
 0x497   :  { %v964_v18 = vadd.f32 %v1920_v17, %v1597_v34  ;;  %v955_v19 = vpop.f32.mrb[47].mxu0  ;;  %1946 = vmatmul.mubr.bf16.gmra.mrb[40].mxu1 %v1006_v11  ;;  %v981_v21 = vmax.f32 %v961_v14, 0.0 }
 0x498   :  { %v956_v20 = vadd.f32 %v1597_v34, %v955_v19  ;;  %v979_v23 = vmax.f32 %v953_v16, 0.0  ;;  %v2081_v34 = vld [vmem:[#allocation2 + $0x1e8] sm:$0xff]   ;;  %1994 = vmatpush3.bf16.msra.mxu1 %v2080_v33 }
 0x499   :  { %v982_v22 = vmax.f32 %v964_v18, 0.0  ;;  %1995 = vmatprep.subr.bf16.mxu1 %v2081_v34 }
 0x49a   :  { %v980_v24 = vmax.f32 %v956_v20, 0.0 }
 0x49b   :  { %v1008_v25 = vpack.c.bf16 %v982_v22, %v981_v21 }
 0x49c   :  { %v1007_v26 = vpack.c.bf16 %v980_v24, %v979_v23  ;;  %1996 = vmatpush3.bf16.msra.mxu1 %v2081_v34 }
 0x49d   :  { %1997 = vmatprep.subr.bf16.mxu1 %v2082_v28 }
 0x49e   :  { %1949 = vmatprep.mubr.bf16.mxu1 %v1007_v26 }
 0x49f   :  { %1950 = vmatmul.mubr.bf16.gmra.mrb[44].mxu1 %v1008_v25 }
 0x4a0   :  { %1998 = vmatpush3.bf16.msra.mxu1 %v2082_v28 }
 0x4a1   :  { %1999 = vmatprep.subr.bf16.mxu1 %v2083_v29 }
 0x4a4   :  { %2000 = vmatpush3.bf16.msra.mxu1 %v2083_v29 }
 0x55a   :  { %v1939_v36 = vpop.f32.mrb[32].mxu1 }
 0x55b   :  { %v1104_v37 = vadd.f32 %v1939_v36, %v1606_v35  ;;  %v1095_v38 = vpop.f32.mrb[33].mxu1 }
 0x55c   :  { %v1096_v39 = vadd.f32 %v1606_v35, %v1095_v38  ;;  %v1940_v40 = vpop.f32.mrb[34].mxu1 }
 0x55d   :  { %v1107_v41 = vadd.f32 %v1940_v40, %v1606_v35  ;;  %v1098_v42 = vpop.f32.mrb[35].mxu1  ;;  %v1160_v44 = vmax.f32 %v1104_v37, 0.0 }
 0x55e   :  { %v1099_v43 = vadd.f32 %v1606_v35, %v1098_v42  ;;  %v1158_v46 = vmax.f32 %v1096_v39, 0.0 }
 0x55f   :  { %v1161_v45 = vmax.f32 %v1107_v41, 0.0 }
 0x560   :  { %v1159_v47 = vmax.f32 %v1099_v43, 0.0 }
 0x561   :  { %v1193_v48 = vpack.c.bf16 %v1161_v45, %v1160_v44 }
 0x562   :  { %v1192_v49 = vpack.c.bf16 %v1159_v47, %v1158_v46  ;;  %v1943_v50 = vpop.f32.mrb[36].mxu1 }
 0x563   :  { %v1120_v51 = vadd.f32 %v1943_v50, %v1606_v35  ;;  %v1111_v52 = vpop.f32.mrb[37].mxu1 }
 0x564   :  { %v1112_v53 = vadd.f32 %v1606_v35, %v1111_v52  ;;  %v1944_v54 = vpop.f32.mrb[38].mxu1  ;;  %1969 = vmatprep.mubr.bf16.mxu0 %v1192_v49 }
 0x565   :  { %v1123_v55 = vadd.f32 %v1944_v54, %v1606_v35  ;;  %v1114_v56 = vpop.f32.mrb[39].mxu1  ;;  %1970 = vmatmul.mubr.bf16.vlgmr.msra.gmra.mrb[48].mxu0 %v1193_v48  ;;  %v1164_v58 = vmax.f32 %v1120_v51, 0.0 }
 0x566   :  { %v1115_v57 = vadd.f32 %v1606_v35, %v1114_v56  ;;  %v1162_v60 = vmax.f32 %v1112_v53, 0.0 }
 0x567   :  { %v1165_v59 = vmax.f32 %v1123_v55, 0.0 }
 0x568   :  { %v1163_v61 = vmax.f32 %v1115_v57, 0.0 }
 0x569   :  { %v1195_v62 = vpack.c.bf16 %v1165_v59, %v1164_v58 }
 0x56a   :  { %v1194_v63 = vpack.c.bf16 %v1163_v61, %v1162_v60  ;;  %v1947_v0 = vpop.f32.mrb[40].mxu1 }
 0x56b   :  { %v1136_v1 = vadd.f32 %v1947_v0, %v1606_v35  ;;  %v1127_v2 = vpop.f32.mrb[41].mxu1 }
 0x56c   :  { %v1128_v3 = vadd.f32 %v1606_v35, %v1127_v2  ;;  %v1948_v4 = vpop.f32.mrb[42].mxu1  ;;  %1973 = vmatprep.mubr.bf16.mxu0 %v1194_v63 }
 0x56d   :  { %v1139_v5 = vadd.f32 %v1948_v4, %v1606_v35  ;;  %v1130_v6 = vpop.f32.mrb[43].mxu1  ;;  %1974 = vmatmul.mubr.bf16.gmra.mrb[52].mxu0 %v1195_v62  ;;  %v1168_v8 = vmax.f32 %v1136_v1, 0.0 }
 0x56e   :  { %v1131_v7 = vadd.f32 %v1606_v35, %v1130_v6  ;;  %v1166_v10 = vmax.f32 %v1128_v3, 0.0 }
 0x56f   :  { %v1169_v9 = vmax.f32 %v1139_v5, 0.0 }
 0x570   :  { %v1167_v11 = vmax.f32 %v1131_v7, 0.0 }
 0x571   :  { %v1197_v12 = vpack.c.bf16 %v1169_v9, %v1168_v8 }
 0x572   :  { %v1196_v13 = vpack.c.bf16 %v1167_v11, %v1166_v10  ;;  %v1951_v14 = vpop.f32.mrb[44].mxu1 }
 0x573   :  { %v1152_v15 = vadd.f32 %v1951_v14, %v1606_v35  ;;  %v1143_v16 = vpop.f32.mrb[45].mxu1 }
 0x574   :  { %v1144_v17 = vadd.f32 %v1606_v35, %v1143_v16  ;;  %v1952_v18 = vpop.f32.mrb[46].mxu1  ;;  %1977 = vmatprep.mubr.bf16.mxu0 %v1196_v13 }
 0x575   :  { %v1155_v19 = vadd.f32 %v1952_v18, %v1606_v35  ;;  %v1146_v20 = vpop.f32.mrb[47].mxu1  ;;  %1978 = vmatmul.mubr.bf16.gmra.mrb[56].mxu0 %v1197_v12  ;;  %v1172_v22 = vmax.f32 %v1152_v15, 0.0 }
 0x576   :  { %v1147_v21 = vadd.f32 %v1606_v35, %v1146_v20  ;;  %v1170_v24 = vmax.f32 %v1144_v17, 0.0 }
 0x577   :  { %v1173_v23 = vmax.f32 %v1155_v19, 0.0 }
 0x578   :  { %v1171_v25 = vmax.f32 %v1147_v21, 0.0 }
 0x579   :  { %v1199_v26 = vpack.c.bf16 %v1173_v23, %v1172_v22  ;;  %v1624_v23 = vld [vmem:[%s2265_s2 + $0x7] ss:$0 sm:$0xff] }
 0x57a   :  { %v1198_v27 = vpack.c.bf16 %v1171_v25, %v1170_v24 }
 0x57c   :  { %1981 = vmatprep.mubr.bf16.mxu0 %v1198_v27 }
 0x57d   :  { %1982 = vmatmul.mubr.bf16.gmra.mrb[60].mxu0 %v1199_v26 }
 0x638   :  { %v1971_v31 = vpop.f32.mrb[48].mxu0 }
 0x639   :  { %v1295_v32 = vadd.f32 %v1971_v31, %v1615_v30  ;;  %v1286_v33 = vpop.f32.mrb[49].mxu0 }
 0x63a   :  { %v1287_v34 = vadd.f32 %v1615_v30, %v1286_v33  ;;  %v1972_v35 = vpop.f32.mrb[50].mxu0 }
 0x63b   :  { %v1298_v36 = vadd.f32 %v1972_v35, %v1615_v30  ;;  %v1289_v37 = vpop.f32.mrb[51].mxu0  ;;  %v1351_v39 = vmax.f32 %v1295_v32, 0.0 }
 0x63c   :  { %v1290_v38 = vadd.f32 %v1615_v30, %v1289_v37  ;;  %v1349_v41 = vmax.f32 %v1287_v34, 0.0 }
 0x63d   :  { %v1352_v40 = vmax.f32 %v1298_v36, 0.0 }
 0x63e   :  { %v1350_v42 = vmax.f32 %v1290_v38, 0.0 }
 0x63f   :  { %v1384_v43 = vpack.c.bf16 %v1352_v40, %v1351_v39 }
 0x640   :  { %v1383_v44 = vpack.c.bf16 %v1350_v42, %v1349_v41  ;;  %v1975_v45 = vpop.f32.mrb[52].mxu0 }
 0x641   :  { %v1311_v46 = vadd.f32 %v1975_v45, %v1615_v30  ;;  %v1302_v47 = vpop.f32.mrb[53].mxu0 }
 0x642   :  { %v1303_v48 = vadd.f32 %v1615_v30, %v1302_v47  ;;  %v1976_v49 = vpop.f32.mrb[54].mxu0  ;;  %2001 = vmatprep.mubr.bf16.mxu1 %v1383_v44 }
 0x643   :  { %v1314_v50 = vadd.f32 %v1976_v49, %v1615_v30  ;;  %v1305_v51 = vpop.f32.mrb[55].mxu0  ;;  %2002 = vmatmul.mubr.bf16.vlgmr.msra.gmra.mrb[48].mxu1 %v1384_v43  ;;  %v1355_v53 = vmax.f32 %v1311_v46, 0.0 }
 0x644   :  { %v1306_v52 = vadd.f32 %v1615_v30, %v1305_v51  ;;  %v1353_v55 = vmax.f32 %v1303_v48, 0.0 }
 0x645   :  { %v1356_v54 = vmax.f32 %v1314_v50, 0.0 }
 0x646   :  { %v1354_v56 = vmax.f32 %v1306_v52, 0.0 }
 0x647   :  { %v1386_v57 = vpack.c.bf16 %v1356_v54, %v1355_v53 }
 0x648   :  { %v1385_v58 = vpack.c.bf16 %v1354_v56, %v1353_v55  ;;  %v1979_v59 = vpop.f32.mrb[56].mxu0 }
 0x649   :  { %v1327_v60 = vadd.f32 %v1979_v59, %v1615_v30  ;;  %v1318_v61 = vpop.f32.mrb[57].mxu0 }
 0x64a   :  { %v1319_v62 = vadd.f32 %v1615_v30, %v1318_v61  ;;  %v1980_v63 = vpop.f32.mrb[58].mxu0  ;;  %2005 = vmatprep.mubr.bf16.mxu1 %v1385_v58 }
 0x64b   :  { %v1330_v0 = vadd.f32 %v1980_v63, %v1615_v30  ;;  %v1321_v1 = vpop.f32.mrb[59].mxu0  ;;  %2006 = vmatmul.mubr.bf16.gmra.mrb[52].mxu1 %v1386_v57  ;;  %v1359_v3 = vmax.f32 %v1327_v60, 0.0 }
 0x64c   :  { %v1322_v2 = vadd.f32 %v1615_v30, %v1321_v1  ;;  %v1357_v5 = vmax.f32 %v1319_v62, 0.0 }
 0x64d   :  { %v1360_v4 = vmax.f32 %v1330_v0, 0.0 }
 0x64e   :  { %v1358_v6 = vmax.f32 %v1322_v2, 0.0 }
 0x64f   :  { %v1388_v7 = vpack.c.bf16 %v1360_v4, %v1359_v3 }
 0x650   :  { %v1387_v8 = vpack.c.bf16 %v1358_v6, %v1357_v5  ;;  %v1983_v9 = vpop.f32.mrb[60].mxu0 }
 0x651   :  { %v1343_v10 = vadd.f32 %v1983_v9, %v1615_v30  ;;  %v1334_v11 = vpop.f32.mrb[61].mxu0 }
 0x652   :  { %v1335_v12 = vadd.f32 %v1615_v30, %v1334_v11  ;;  %v1984_v13 = vpop.f32.mrb[62].mxu0  ;;  %2009 = vmatprep.mubr.bf16.mxu1 %v1387_v8 }
 0x653   :  { %v1346_v14 = vadd.f32 %v1984_v13, %v1615_v30  ;;  %v1337_v15 = vpop.f32.mrb[63].mxu0  ;;  %2010 = vmatmul.mubr.bf16.gmra.mrb[56].mxu1 %v1388_v7  ;;  %v1363_v17 = vmax.f32 %v1343_v10, 0.0 }
 0x654   :  { %v1338_v16 = vadd.f32 %v1615_v30, %v1337_v15  ;;  %v1361_v19 = vmax.f32 %v1335_v12, 0.0 }
 0x655   :  { %v1364_v18 = vmax.f32 %v1346_v14, 0.0 }
 0x656   :  { %v1362_v20 = vmax.f32 %v1338_v16, 0.0 }
 0x657   :  { %v1390_v21 = vpack.c.bf16 %v1364_v18, %v1363_v17 }
 0x658   :  { %v1389_v22 = vpack.c.bf16 %v1362_v20, %v1361_v19 }
 0x65a   :  { %2013 = vmatprep.mubr.bf16.mxu1 %v1389_v22 }
 0x65b   :  { %2014 = vmatmul.mubr.bf16.gmra.mrb[60].mxu1 %v1390_v21 }
 0x716   :  { %v2003_v24 = vpop.f32.mrb[48].mxu1 }
 0x717   :  { %v1486_v25 = vadd.f32 %v2003_v24, %v1624_v23  ;;  %v1477_v26 = vpop.f32.mrb[49].mxu1 }
 0x718   :  { %v1478_v27 = vadd.f32 %v1624_v23, %v1477_v26  ;;  %v2004_v28 = vpop.f32.mrb[50].mxu1 }
 0x719   :  { %1542 = vst [vmem:[%s2266_s3 + $0x10] sm:$0xff] %v1486_v25  ;;  %v1489_v29 = vadd.f32 %v2004_v28, %v1624_v23  ;;  %v1480_v30 = vpop.f32.mrb[51].mxu1 }
 0x71a   :  { %1540 = vst [vmem:[%s2266_s3] sm:$0xff] %v1478_v27  ;;  %v1481_v31 = vadd.f32 %v1624_v23, %v1480_v30 }
 0x71b   :  { %1543 = vst [vmem:[%s2266_s3 + $0x18] sm:$0xff] %v1489_v29 }
 0x71c   :  { %1541 = vst [vmem:[%s2266_s3 + $0x8] sm:$0xff] %v1481_v31 }
 0x71e   :  { %v2007_v32 = vpop.f32.mrb[52].mxu1 }
 0x71f   :  { %v1502_v33 = vadd.f32 %v2007_v32, %v1624_v23  ;;  %v1493_v34 = vpop.f32.mrb[53].mxu1 }
 0x720   :  { %v1494_v35 = vadd.f32 %v1624_v23, %v1493_v34  ;;  %v2008_v36 = vpop.f32.mrb[54].mxu1 }
 0x721   :  { %1546 = vst [vmem:[%s2266_s3 + $0x30] sm:$0xff] %v1502_v33  ;;  %v1505_v37 = vadd.f32 %v2008_v36, %v1624_v23  ;;  %v1496_v38 = vpop.f32.mrb[55].mxu1 }
 0x722   :  { %1544 = vst [vmem:[%s2266_s3 + $0x20] sm:$0xff] %v1494_v35  ;;  %v1497_v39 = vadd.f32 %v1624_v23, %v1496_v38 }
 0x723   :  { %1547 = vst [vmem:[%s2266_s3 + $0x38] sm:$0xff] %v1505_v37 }
 0x724   :  { %1545 = vst [vmem:[%s2266_s3 + $0x28] sm:$0xff] %v1497_v39 }
 0x726   :  { %v2011_v40 = vpop.f32.mrb[56].mxu1 }
 0x727   :  { %v1518_v41 = vadd.f32 %v2011_v40, %v1624_v23  ;;  %v1509_v42 = vpop.f32.mrb[57].mxu1 }
 0x728   :  { %v1510_v43 = vadd.f32 %v1624_v23, %v1509_v42  ;;  %v2012_v44 = vpop.f32.mrb[58].mxu1 }
 0x729   :  { %1550 = vst [vmem:[%s2266_s3 + $0x50] sm:$0xff] %v1518_v41  ;;  %v1521_v45 = vadd.f32 %v2012_v44, %v1624_v23  ;;  %v1512_v46 = vpop.f32.mrb[59].mxu1 }
 0x72a   :  { %1548 = vst [vmem:[%s2266_s3 + $0x40] sm:$0xff] %v1510_v43  ;;  %v1513_v47 = vadd.f32 %v1624_v23, %v1512_v46 }
 0x72b   :  { %1551 = vst [vmem:[%s2266_s3 + $0x58] sm:$0xff] %v1521_v45 }
 0x72c   :  { %1549 = vst [vmem:[%s2266_s3 + $0x48] sm:$0xff] %v1513_v47 }
 0x72e   :  { %v2015_v48 = vpop.f32.mrb[60].mxu1 }
 0x72f   :  { %v1534_v49 = vadd.f32 %v2015_v48, %v1624_v23  ;;  %v1525_v50 = vpop.f32.mrb[61].mxu1 }
 0x730   :  { %v1526_v51 = vadd.f32 %v1624_v23, %v1525_v50  ;;  %v2016_v52 = vpop.f32.mrb[62].mxu1 }
 0x731   :  { %1554 = vst [vmem:[%s2266_s3 + $0x70] sm:$0xff] %v1534_v49  ;;  %v1537_v53 = vadd.f32 %v2016_v52, %v1624_v23  ;;  %v1528_v54 = vpop.f32.mrb[63].mxu1 }
 0x732   :  { %1552 = vst [vmem:[%s2266_s3 + $0x60] sm:$0xff] %v1526_v51  ;;  %v1529_v55 = vadd.f32 %v1624_v23, %v1528_v54 }
 0x733   :  { %1555 = vst [vmem:[%s2266_s3 + $0x78] sm:$0xff] %v1537_v53 }
 0x734   :  { %1553 = vst [vmem:[%s2266_s3 + $0x68] sm:$0xff] %v1529_v55 }
 0x735   :  { %1560 = vsyncpa [#allocation3], 1 }

</bundles_post_ra>
